<compile_context>
chip_gen: v7x
topology: tpu7x:2x2x1
jax: 0.10.0
libtpu: 0.0.40
codegen_flags: <defaults>
</compile_context>

<pallas_src>
import math

import jax
import jax.numpy as jnp
from jax.experimental import pallas as pl
from jax.experimental.pallas import tpu as pltpu


def _logreg_kernel(x_ref, w_ref, b_ref, o_ref):
    # x_ref: (TB, D) f32 VMEM    w_ref: (D, 1) f32 VMEM (stationary MXU operand)
    # b_ref: (1, 1)  f32 SMEM    o_ref: (TB, 1) f32 VMEM
    acc = jnp.dot(x_ref[...], w_ref[...], preferred_element_type=jnp.float32)
    o_ref[...] = acc + b_ref[0, 0]


def _round_up(x, m):
    return (x + m - 1) // m * m


def logistic_regression_forward(x, weight, bias):
    """x: (B, ...) f32; weight: (1, D) f32 with D = prod(trailing dims); bias: (1,) f32."""
    B = x.shape[0]
    D = math.prod(x.shape[1:])

    x2d = x.reshape(B, D)                          # nn.Flatten — metadata-only reshape, stays f32
    w_col = weight.reshape(D, 1).astype(jnp.float32)
    b2d = bias.reshape(1, 1).astype(jnp.float32)   # scalar, lives in SMEM

    # Batch tile: multiple of 8 sublanes, ~8 MiB of f32 per tile. Double-buffered that is
    # ~16 MiB of x in VMEM — fits every generation (v7x: 64 MiB physical) while amortizing
    # the ~0.35 us/step grid overhead. Keep >= 2 grid steps when B allows it so the
    # "parallel" batch axis can be sharded across v7x's two TensorCores.
    bytes_per_row = D * x2d.dtype.itemsize
    target_tile_bytes = 8 * 1024 * 1024
    tb = max(8, (target_tile_bytes // bytes_per_row) // 8 * 8)
    tb = min(tb, _round_up(pl.cdiv(B, 2), 8))
    TB = max(8, tb)
    grid = pl.cdiv(B, TB)
    # TODO(synk): add a K-reduction grid axis if D ever grows so large that even an (8, D)
    # f32 tile no longer fits the per-generation VMEM budget.

    out = pl.pallas_call(
        _logreg_kernel,
        out_shape=jax.ShapeDtypeStruct((B, 1), jnp.float32),
        grid_spec=pltpu.PrefetchScalarGridSpec(
            num_scalar_prefetch=0,
            grid=(grid,),
            in_specs=[
                pl.BlockSpec((TB, D), lambda i: (i, 0)),
                pl.BlockSpec((D, 1), lambda i: (0, 0)),
                pl.BlockSpec(memory_space=pltpu.MemorySpace.SMEM),
            ],
            out_specs=pl.BlockSpec((TB, 1), lambda i: (i, 0)),
        ),
        compiler_params=pltpu.CompilerParams(
            dimension_semantics=("parallel",),     # shards batch tiles across TCs on v7x
            # ~16 MiB double-buffered x + lane-padded out/w buffers ~= 19 MiB; 48 MiB gives
            # pipelining headroom yet stays under v7x's 64 MiB physical VMEM.
            vmem_limit_bytes=48 * 1024 * 1024,
        ),
        cost_estimate=pl.CostEstimate(
            flops=2 * B * D,
            bytes_accessed=(x2d.size * x2d.dtype.itemsize
                            + w_col.size * w_col.dtype.itemsize
                            + B * 4),
            transcendentals=0,
        ),
    )(x2d, w_col, b2d)
    return out


if __name__ == "__main__":
    # Small shapes consistent with the module: x = (B=2, C=4, H=16, W=16) -> input_dim = 1024
    B, C, H, W = 2, 4, 16, 16
    D = C * H * W

    key = jax.random.PRNGKey(0)
    kx, kw, kb = jax.random.split(key, 3)

    x = jax.random.normal(kx, (B, C, H, W), dtype=jnp.float32)

    # Deterministic parameter init mimicking nn.Linear's U(-1/sqrt(D), 1/sqrt(D))
    bound = 1.0 / math.sqrt(D)
    weight = jax.random.uniform(kw, (1, D), minval=-bound, maxval=bound, dtype=jnp.float32)
    bias = jax.random.uniform(kb, (1,), minval=-bound, maxval=bound, dtype=jnp.float32)

    out = logistic_regression_forward(x, weight, bias)
    jax.block_until_ready(out)

    # f32 reference (elementwise multiply + f32 reduce). Tolerance covers the MXU's
    # default-precision passes for f32 operands.
    ref = jnp.sum(x.reshape(B, D) * weight, axis=-1, keepdims=True) + bias

    assert out.shape == (B, 1)
    assert jnp.allclose(out, ref, atol=1e-2, rtol=1e-2)

    print("KERNEL_OK")
</pallas_src>

<mosaic_0001>
module attributes {stable_mosaic.version = 11 : i64} {
  func.func @_logreg_kernel(%arg0: i32, %arg1: memref<8x1024xf32, #tpu.memory_space<vmem>>, %arg2: memref<1024x1xf32, #tpu.memory_space<vmem>>, %arg3: memref<1x1xf32, #tpu.memory_space<smem>>, %arg4: memref<8x1xf32, #tpu.memory_space<vmem>>) attributes {dimension_semantics = [#tpu.dimension_semantics<parallel>], iteration_bounds = array<i64: 1>, scalar_prefetch = 0 : i64, scratch_operands = 0 : i64, tpu.core_type = #tpu.core_type<tc>, window_params = [{transform_indices = @transform_0, window_bounds = array<i64: 8, 1024>}, {pipeline_mode = #tpu.pipeline_mode<synchronous>, transform_indices = @transform_1, window_bounds = array<i64: 1024, 1>}, {transform_indices = @transform_2, window_bounds = array<i64: 1, 1>}, {transform_indices = @transform_3, window_bounds = array<i64: 8, 1>}]} {
    %c0 = arith.constant 0 : index
    %c0_0 = arith.constant 0 : index
    %0 = vector.load %arg1[%c0, %c0_0] : memref<8x1024xf32, #tpu.memory_space<vmem>>, vector<8x1024xf32>
    %c0_1 = arith.constant 0 : index
    %c0_2 = arith.constant 0 : index
    %1 = vector.load %arg2[%c0_1, %c0_2] : memref<1024x1xf32, #tpu.memory_space<vmem>>, vector<1024x1xf32>
    %cst = arith.constant dense<0.000000e+00> : vector<8x1xf32>
    %2 = tpu.matmul %0, %1, %cst {dimension_numbers = #tpu.dot_dimension_numbers<[1], [0], [0], [1], [0, 0, 1, 1], [], []>} : vector<8x1024xf32>, vector<1024x1xf32>, vector<8x1xf32> -> vector<8x1xf32>
    %c0_3 = arith.constant 0 : index
    %c0_4 = arith.constant 0 : index
    %3 = memref.load %arg3[%c0_3, %c0_4] : memref<1x1xf32, #tpu.memory_space<smem>>
    %4 = vector.broadcast %3 : f32 to vector<8x1xf32>
    %5 = arith.addf %2, %4 : vector<8x1xf32>
    %c0_5 = arith.constant 0 : index
    %c0_6 = arith.constant 0 : index
    %6 = vector.load %arg4[%c0_5, %c0_6] : memref<8x1xf32, #tpu.memory_space<vmem>>, vector<8x1xf32>
    tpu.vector_store %arg4[%c0_5, %c0_6], %5 {strides = array<i32>} : memref<8x1xf32, #tpu.memory_space<vmem>>, vector<8x1xf32>,
    return
  }
  func.func @transform_0(%arg0: i32) -> (i32, i32) {
    %c0_i32 = arith.constant 0 : i32
    %c0_i32_0 = arith.constant 0 : i32
    return %arg0, %c0_i32 : i32, i32
  }
  func.func @transform_1(%arg0: i32) -> (i32, i32) {
    %c0_i32 = arith.constant 0 : i32
    %c0_i32_0 = arith.constant 0 : i32
    %c0_i32_1 = arith.constant 0 : i32
    return %c0_i32, %c0_i32_0 : i32, i32
  }
  func.func @transform_2(%arg0: i32) -> (i32, i32) {
    %c0_i32 = arith.constant 0 : i32
    %c0_i32_0 = arith.constant 0 : i32
    %c0_i32_1 = arith.constant 0 : i32
    return %c0_i32, %c0_i32_0 : i32, i32
  }
  func.func @transform_3(%arg0: i32) -> (i32, i32) {
    %c0_i32 = arith.constant 0 : i32
    %c0_i32_0 = arith.constant 0 : i32
    return %arg0, %c0_i32 : i32, i32
  }
}

</mosaic_0001>

<bundles_post_ra>
// kernel: tpu_custom_call.1
= control target key start
LH: loop header
LB: loop body
LE: loop exit
PB: predicated region body
PF: predicated region fallthrough
CT: control target
= control target key end

     0   :  { %v843_v51 = vmov 1983009808   ;;  %v168_v53 = vlaneseq  ;;  %vm521_vm0 = vcmask 7168   ;;  %s1288_s0 = inlined_call_operand.vmem [shape: f32[2,1024], index: 0, kind: input, shape index: {}]   ;;  %s1289_s1 = inlined_call_operand.vmem [shape: f32[1024,1], index: 1, kind: input, shape index: {}]   ;;  %s1290_s2 = inlined_call_operand.<no memory space> [shape: f32[1,1], index: 2, kind: input, shape index: {}]   ;;  %s1291_s3 = inlined_call_operand.vmem [shape: f32[2,1], index: 3, kind: output, shape index: {}]  }
   0x1   :  { %v39_v0 = vld [vmem:[%s1289_s1 + $0x80] sm:$0xff]  ;;  %v40_v1 = vld [vmem:[%s1289_s1 + $0x88] sm:$0xff]  ;;  %v41_v11 = vld [vmem:[%s1289_s1 + $0x90] sm:$0xff]  ;;  %v166_v52 = vunpack.c.l.s4 %v843_v51 }
   0x2   :  { %v23_v2 = vld [vmem:[%s1289_s1] sm:$0xff]  ;;  %v702_v3 = vpack.c.bf16 %v40_v1, %v39_v0  ;;  %v24_v4 = vld [vmem:[%s1289_s1 + $0x8] sm:$0xff]  ;;  %v42_v13 = vld [vmem:[%s1289_s1 + $0x98] sm:$0xff] }
   0x3   :  { %v71_v5 = vld [vmem:[%s1289_s1 + $0x180] sm:$0xff]  ;;  %v72_v6 = vld [vmem:[%s1289_s1 + $0x188] sm:$0xff]  ;;  %v704_v7 = vpack.c.bf16 %v24_v4, %v23_v2  ;;  %v25_v14 = vld [vmem:[%s1289_s1 + $0x10] sm:$0xff]  ;;  %v706_v16 = vpack.c.bf16 %v42_v13, %v41_v11  ;;  %v167_v2 = vunpack.c.0.s8 %v166_v52 }
   0x4   :  { %v734_v8 = vpack.c.bf16 %v72_v6, %v71_v5  ;;  %v55_v9 = vld [vmem:[%s1289_s1 + $0x100] sm:$0xff]  ;;  %v56_v10 = vld [vmem:[%s1289_s1 + $0x108] sm:$0xff]  ;;  %703 = vmatprep.subr.bf16.mxu0 %v702_v3  ;;  %v26_v15 = vld [vmem:[%s1289_s1 + $0x18] sm:$0xff]  ;;  %v169_v3 = vshrl.u32 %v168_v53, 7 }
   0x5   :  { %v736_v12 = vpack.c.bf16 %v56_v10, %v55_v9  ;;  %705 = vmatpush3.bf16.msra.mxu0 %v704_v7  ;;  %v708_v17 = vpack.c.bf16 %v26_v15, %v25_v14  ;;  %v73_v18 = vld [vmem:[%s1289_s1 + $0x190] sm:$0xff]  ;;  %v74_v19 = vld [vmem:[%s1289_s1 + $0x198] sm:$0xff]  ;;  %v43_v23 = vld [vmem:[%s1289_s1 + $0xa0] sm:$0xff] }
   0x6   :  { %735 = vmatprep.subr.bf16.mxu1 %v734_v8  ;;  %v57_v20 = vld [vmem:[%s1289_s1 + $0x110] sm:$0xff]  ;;  %v738_v21 = vpack.c.bf16 %v74_v19, %v73_v18  ;;  %v58_v22 = vld [vmem:[%s1289_s1 + $0x118] sm:$0xff]  ;;  %v44_v24 = vld [vmem:[%s1289_s1 + $0xa8] sm:$0xff]  ;;  %707 = vmatprep.subr.bf16.mxu0 %v706_v16 }
   0x7   :  { %737 = vmatpush3.bf16.msra.mxu1 %v736_v12  ;;  %v740_v25 = vpack.c.bf16 %v58_v22, %v57_v20  ;;  %v710_v26 = vpack.c.bf16 %v44_v24, %v43_v23  ;;  %v27_v27 = vld [vmem:[%s1289_s1 + $0x20] sm:$0xff]  ;;  %v28_v28 = vld [vmem:[%s1289_s1 + $0x28] sm:$0xff]  ;;  %v45_v35 = vld [vmem:[%s1289_s1 + $0xb0] sm:$0xff] }
   0x8   :  { %v75_v29 = vld [vmem:[%s1289_s1 + $0x1a0] sm:$0xff]  ;;  %739 = vmatprep.subr.bf16.mxu1 %v738_v21  ;;  %v76_v30 = vld [vmem:[%s1289_s1 + $0x1a8] sm:$0xff]  ;;  %v712_v33 = vpack.c.bf16 %v28_v28, %v27_v27  ;;  %v46_v36 = vld [vmem:[%s1289_s1 + $0xb8] sm:$0xff]  ;;  %v1035_v21 = vsub.s32 %v167_v2, %v169_v3 }
   0x9   :  { %v59_v31 = vld [vmem:[%s1289_s1 + $0x120] sm:$0xff]  ;;  %v60_v32 = vld [vmem:[%s1289_s1 + $0x128] sm:$0xff]  ;;  %709 = vmatpush3.bf16.msra.mxu0 %v708_v17  ;;  %v742_v34 = vpack.c.bf16 %v76_v30, %v75_v29  ;;  %v29_v37 = vld [vmem:[%s1289_s1 + $0x30] sm:$0xff]  ;;  %v714_v39 = vpack.c.bf16 %v46_v36, %v45_v35 }
   0xa   :  { %711 = vmatprep.subr.bf16.mxu0 %v710_v26  ;;  %v744_v38 = vpack.c.bf16 %v60_v32, %v59_v31  ;;  %v30_v40 = vld [vmem:[%s1289_s1 + $0x38] sm:$0xff]  ;;  %v77_v41 = vld [vmem:[%s1289_s1 + $0x1b0] sm:$0xff]  ;;  %v47_v46 = vld [vmem:[%s1289_s1 + $0xc0] sm:$0xff] }
   0xb   :  { %741 = vmatpush3.bf16.msra.mxu1 %v740_v25  ;;  %v78_v42 = vld [vmem:[%s1289_s1 + $0x1b8] sm:$0xff]  ;;  %v61_v44 = vld [vmem:[%s1289_s1 + $0x130] sm:$0xff]  ;;  %v48_v47 = vld [vmem:[%s1289_s1 + $0xc8] sm:$0xff]  ;;  %v716_v48 = vpack.c.bf16 %v30_v40, %v29_v37 }
   0xc   :  { %743 = vmatprep.subr.bf16.mxu1 %v742_v34  ;;  %v746_v43 = vpack.c.bf16 %v78_v42, %v77_v41  ;;  %v62_v45 = vld [vmem:[%s1289_s1 + $0x138] sm:$0xff]  ;;  %v79_v49 = vld [vmem:[%s1289_s1 + $0x1c0] sm:$0xff]  ;;  %v80_v50 = vld [vmem:[%s1289_s1 + $0x1c8] sm:$0xff]  ;;  %v718_v55 = vpack.c.bf16 %v48_v47, %v47_v46 }
   0xd   :  { %713 = vmatpush3.bf16.msra.mxu0 %v712_v33  ;;  %v748_v54 = vpack.c.bf16 %v62_v45, %v61_v44  ;;  %v31_v56 = vld [vmem:[%s1289_s1 + $0x40] sm:$0xff]  ;;  %v32_v57 = vld [vmem:[%s1289_s1 + $0x48] sm:$0xff]  ;;  %v750_v59 = vpack.c.bf16 %v80_v50, %v79_v49  ;;  %v49_v61 = vld [vmem:[%s1289_s1 + $0xd0] sm:$0xff] }
   0xe   :  { %715 = vmatprep.subr.bf16.mxu0 %v714_v39  ;;  %v63_v58 = vld [vmem:[%s1289_s1 + $0x140] sm:$0xff]  ;;  %v64_v60 = vld [vmem:[%s1289_s1 + $0x148] sm:$0xff]  ;;  %v50_v62 = vld [vmem:[%s1289_s1 + $0xd8] sm:$0xff]  ;;  %v720_v1 = vpack.c.bf16 %v32_v57, %v31_v56 }
   0xf   :  { %745 = vmatpush3.bf16.msra.mxu1 %v744_v38  ;;  %v81_v63 = vld [vmem:[%s1289_s1 + $0x1d0] sm:$0xff]  ;;  %v82_v0 = vld [vmem:[%s1289_s1 + $0x1d8] sm:$0xff]  ;;  %v752_v4 = vpack.c.bf16 %v64_v60, %v63_v58  ;;  %v722_v5 = vpack.c.bf16 %v50_v62, %v49_v61  ;;  %v51_v11 = vld [vmem:[%s1289_s1 + $0xe0] sm:$0xff] }
  0x10   :  { %747 = vmatprep.subr.bf16.mxu1 %v746_v43  ;;  %v33_v6 = vld [vmem:[%s1289_s1 + $0x50] sm:$0xff]  ;;  %v34_v7 = vld [vmem:[%s1289_s1 + $0x58] sm:$0xff]  ;;  %v754_v9 = vpack.c.bf16 %v82_v0, %v81_v63  ;;  %v52_v12 = vld [vmem:[%s1289_s1 + $0xe8] sm:$0xff] }
  0x11   :  { %717 = vmatpush3.bf16.msra.mxu0 %v716_v48  ;;  %v65_v8 = vld [vmem:[%s1289_s1 + $0x150] sm:$0xff]  ;;  %v66_v10 = vld [vmem:[%s1289_s1 + $0x158] sm:$0xff]  ;;  %v35_v13 = vld [vmem:[%s1289_s1 + $0x60] sm:$0xff]  ;;  %v724_v17 = vpack.c.bf16 %v34_v7, %v33_v6  ;;  %v726_v23 = vpack.c.bf16 %v52_v12, %v51_v11 }
  0x12   :  { %719 = vmatprep.subr.bf16.mxu0 %v718_v55  ;;  %v36_v14 = vld [vmem:[%s1289_s1 + $0x68] sm:$0xff]  ;;  %v83_v15 = vld [vmem:[%s1289_s1 + $0x1e0] sm:$0xff]  ;;  %v53_v20 = vld [vmem:[%s1289_s1 + $0xf0] sm:$0xff]  ;;  %v756_v22 = vpack.c.bf16 %v66_v10, %v65_v8 }
  0x13   :  { %749 = vmatpush3.bf16.msra.mxu1 %v748_v54  ;;  %v84_v16 = vld [vmem:[%s1289_s1 + $0x1e8] sm:$0xff]  ;;  %v67_v18 = vld [vmem:[%s1289_s1 + $0x160] sm:$0xff]  ;;  %v54_v24 = vld [vmem:[%s1289_s1 + $0xf8] sm:$0xff]  ;;  %v728_v30 = vpack.c.bf16 %v36_v14, %v35_v13 }
  0x14   :  { %751 = vmatprep.subr.bf16.mxu1 %v750_v59  ;;  %v68_v19 = vld [vmem:[%s1289_s1 + $0x168] sm:$0xff]  ;;  %v758_v25 = vpack.c.bf16 %v84_v16, %v83_v15  ;;  %v831_v26 = vld [vmem:[%s1288_s0] ss:$16 sps:$4 sm:$0xff]   ;;  %v86_v28 = vld [vmem:[%s1289_s1 + $0x1f8] sm:$0xff]  ;;  %v730_v35 = vpack.c.bf16 %v54_v24, %v53_v20 }
  0x15   :  { %721 = vmatpush3.bf16.msra.mxu0 %v720_v1  ;;  %v85_v27 = vld [vmem:[%s1289_s1 + $0x1f0] sm:$0xff]  ;;  %v171_v31 = vrot.slane %v831_v26, %v1035_v21  ;;  %v760_v34 = vpack.c.bf16 %v68_v19, %v67_v18  ;;  %v38_v37 = vld [vmem:[%s1289_s1 + $0x78] sm:$0xff]  ;;  %v103_v42 = vld [vmem:[%s1289_s1 + $0x280] sm:$0xff] }
  0x16   :  { %723 = vmatprep.subr.bf16.mxu0 %v722_v5  ;;  %v833_v29 = vld [vmem:[%s1288_s0 + $0x20] ss:$16 sps:$4 sm:$0xff]   ;;  %v835_v32 = vld [vmem:[%s1288_s0 + $0x4] ss:$16 sps:$4 sm:$0xff]   ;;  %v762_v40 = vpack.c.bf16 %v86_v28, %v85_v27  ;;  %v70_v41 = vld [vmem:[%s1289_s1 + $0x178] sm:$0xff] }
  0x17   :  { %753 = vmatpush3.bf16.msra.mxu1 %v752_v4  ;;  %v836_v33 = vld [vmem:[%s1288_s0 + $0x24] ss:$16 sps:$4 sm:$0xff]   ;;  %v185_v39 = vrot.slane %v833_v29, %v1035_v21  ;;  %v104_v43 = vld [vmem:[%s1289_s1 + $0x288] sm:$0xff]  ;;  %v178_v44 = vrot.slane %v835_v32, %v1035_v21  ;;  %v106_v59 = vld [vmem:[%s1289_s1 + $0x298] sm:$0xff] }
  0x18   :  { %755 = vmatprep.subr.bf16.mxu1 %v754_v9  ;;  %v37_v36 = vld [vmem:[%s1289_s1 + $0x70] sm:$0xff]  ;;  %v192_v45 = vrot.slane %v836_v33, %v1035_v21  ;;  %v135_v47 = vld [vmem:[%s1289_s1 + $0x380] sm:$0xff]  ;;  %v136_v48 = vld [vmem:[%s1289_s1 + $0x388] sm:$0xff]  ;;  %v766_v52 = vpack.c.bf16 %v104_v43, %v103_v42 }
  0x19   :  { %725 = vmatpush3.bf16.msra.mxu0 %v724_v17  ;;  %v69_v38 = vld [vmem:[%s1289_s1 + $0x170] sm:$0xff]  ;;  %v194_v46 = vcombine.high %v171_v31, %v185_v39  ;;  %v732_v49 = vpack.c.bf16 %v38_v37, %v37_v36  ;;  %v87_v53 = vld [vmem:[%s1289_s1 + $0x200] sm:$0xff]  ;;  %v88_v54 = vld [vmem:[%s1289_s1 + $0x208] sm:$0xff]  ;;  %v798_v56 = vpack.c.bf16 %v136_v48, %v135_v47  ;;  %v193_v60 = vcombine.low %v171_v31, %v185_v39 }
  0x1a   :  { %727 = vmatprep.subr.bf16.mxu0 %v726_v23  ;;  %v196_v50 = vcombine.high %v178_v44, %v192_v45  ;;  %v764_v51 = vpack.c.bf16 %v70_v41, %v69_v38  ;;  %v119_v55 = vld [vmem:[%s1289_s1 + $0x300] sm:$0xff]  ;;  %v120_v57 = vld [vmem:[%s1289_s1 + $0x308] sm:$0xff]  ;;  %v105_v58 = vld [vmem:[%s1289_s1 + $0x290] sm:$0xff]  ;;  %v768_v63 = vpack.c.bf16 %v88_v54, %v87_v53  ;;  %v195_v0 = vcombine.low %v178_v44, %v192_v45 }
  0x1b   :  { %757 = vmatpush3.bf16.msra.mxu1 %v756_v22  ;;  %305 = vmatprep.mubr.f32.mxu0 %v194_v46  ;;  %v137_v61 = vld [vmem:[%s1289_s1 + $0x390] sm:$0xff]  ;;  %v138_v62 = vld [vmem:[%s1289_s1 + $0x398] sm:$0xff]  ;;  %v800_v1 = vpack.c.bf16 %v120_v57, %v119_v55  ;;  %v770_v2 = vpack.c.bf16 %v106_v59, %v105_v58  ;;  %v107_v8 = vld [vmem:[%s1289_s1 + $0x2a0] sm:$0xff] }
  0x1c   :  { %759 = vmatprep.subr.bf16.mxu1 %v758_v25  ;;  %375 = vmatprep.mubr.f32.mxu1 %v196_v50  ;;  %v89_v3 = vld [vmem:[%s1289_s1 + $0x210] sm:$0xff]  ;;  %v90_v4 = vld [vmem:[%s1289_s1 + $0x218] sm:$0xff]  ;;  %v802_v6 = vpack.c.bf16 %v138_v62, %v137_v61  ;;  %v108_v9 = vld [vmem:[%s1289_s1 + $0x2a8] sm:$0xff] }
  0x1d   :  { %729 = vmatpush3.bf16.msra.mxu0 %v728_v30  ;;  %v121_v5 = vld [vmem:[%s1289_s1 + $0x310] sm:$0xff]  ;;  %v122_v7 = vld [vmem:[%s1289_s1 + $0x318] sm:$0xff]  ;;  %v139_v10 = vld [vmem:[%s1289_s1 + $0x3a0] sm:$0xff]  ;;  %v772_v12 = vpack.c.bf16 %v90_v4, %v89_v3  ;;  %v774_v14 = vpack.c.bf16 %v108_v9, %v107_v8 }
  0x1e   :  { %731 = vmatprep.subr.bf16.mxu0 %v730_v35  ;;  %v140_v11 = vld [vmem:[%s1289_s1 + $0x3a8] sm:$0xff]  ;;  %v804_v13 = vpack.c.bf16 %v122_v7, %v121_v5  ;;  %v91_v15 = vld [vmem:[%s1289_s1 + $0x220] sm:$0xff]  ;;  %v109_v20 = vld [vmem:[%s1289_s1 + $0x2b0] sm:$0xff] }
  0x1f   :  { %761 = vmatpush3.bf16.msra.mxu1 %v760_v34  ;;  %v92_v16 = vld [vmem:[%s1289_s1 + $0x228] sm:$0xff]  ;;  %v123_v17 = vld [vmem:[%s1289_s1 + $0x320] sm:$0xff]  ;;  %v806_v18 = vpack.c.bf16 %v140_v11, %v139_v10  ;;  %v110_v22 = vld [vmem:[%s1289_s1 + $0x2b8] sm:$0xff] }
  0x20   :  { %763 = vmatprep.subr.bf16.mxu1 %v762_v40  ;;  %v124_v19 = vld [vmem:[%s1289_s1 + $0x328] sm:$0xff]  ;;  %v141_v23 = vld [vmem:[%s1289_s1 + $0x3b0] sm:$0xff]  ;;  %v142_v24 = vld [vmem:[%s1289_s1 + $0x3b8] sm:$0xff]  ;;  %v776_v25 = vpack.c.bf16 %v92_v16, %v91_v15  ;;  %v778_v27 = vpack.c.bf16 %v110_v22, %v109_v20 }
  0x21   :  { %733 = vmatpush3.bf16.msra.mxu0 %v732_v49  ;;  %v808_v26 = vpack.c.bf16 %v124_v19, %v123_v17  ;;  %v93_v28 = vld [vmem:[%s1289_s1 + $0x230] sm:$0xff]  ;;  %v94_v29 = vld [vmem:[%s1289_s1 + $0x238] sm:$0xff]  ;;  %v810_v31 = vpack.c.bf16 %v142_v24, %v141_v23  ;;  %v111_v33 = vld [vmem:[%s1289_s1 + $0x2c0] sm:$0xff] }
  0x22   :  { %767 = vmatprep.subr.bf16.mxu0 %v766_v52  ;;  %v125_v30 = vld [vmem:[%s1289_s1 + $0x330] sm:$0xff]  ;;  %v126_v32 = vld [vmem:[%s1289_s1 + $0x338] sm:$0xff]  ;;  %v112_v34 = vld [vmem:[%s1289_s1 + $0x2c8] sm:$0xff]  ;;  %v780_v40 = vpack.c.bf16 %v94_v29, %v93_v28 }
  0x23   :  { %765 = vmatpush3.bf16.msra.mxu1 %v764_v51  ;;  %v95_v35 = vld [vmem:[%s1289_s1 + $0x240] sm:$0xff]  ;;  %v96_v36 = vld [vmem:[%s1289_s1 + $0x248] sm:$0xff]  ;;  %v113_v42 = vld [vmem:[%s1289_s1 + $0x2d0] sm:$0xff]  ;;  %v812_v44 = vpack.c.bf16 %v126_v32, %v125_v30  ;;  %v782_v45 = vpack.c.bf16 %v112_v34, %v111_v33  ;;  %v152_v32 = vstv %s1290_s2 }
  0x24   :  { %799 = vmatprep.subr.bf16.mxu1 %v798_v56  ;;  %306 = vmatmul.mubr.f32.vlgmr.msra.gmra.mrb[0].mxu0 %v193_v60  ;;  %v143_v37 = vld [vmem:[%s1289_s1 + $0x3c0] sm:$0xff]  ;;  %v144_v38 = vld [vmem:[%s1289_s1 + $0x3c8] sm:$0xff]  ;;  %v114_v43 = vld [vmem:[%s1289_s1 + $0x2d8] sm:$0xff]  ;;  %v784_v53 = vpack.c.bf16 %v96_v36, %v95_v35 }
  0x25   :  { %769 = vmatpush3.bf16.msra.mxu0 %v768_v63  ;;  %v127_v39 = vld [vmem:[%s1289_s1 + $0x340] sm:$0xff]  ;;  %v128_v41 = vld [vmem:[%s1289_s1 + $0x348] sm:$0xff]  ;;  %v145_v46 = vld [vmem:[%s1289_s1 + $0x3d0] sm:$0xff]  ;;  %v814_v48 = vpack.c.bf16 %v144_v38, %v143_v37  ;;  %v786_v55 = vpack.c.bf16 %v114_v43, %v113_v42 }
  0x26   :  { %376 = vmatmul.mubr.f32.vlgmr.msra.gmra.mrb[0].mxu1 %v195_v0  ;;  %771 = vmatprep.subr.bf16.mxu0 %v770_v2  ;;  %v146_v47 = vld [vmem:[%s1289_s1 + $0x3d8] sm:$0xff]  ;;  %v816_v54 = vpack.c.bf16 %v128_v41, %v127_v39  ;;  %v97_v57 = vld [vmem:[%s1289_s1 + $0x250] sm:$0xff]  ;;  %v116_v2 = vld [vmem:[%s1289_s1 + $0x2e8] sm:$0xff] }
  0x27   :  { %801 = vmatpush3.bf16.msra.mxu1 %v800_v1  ;;  %v837_v49 = vld [vmem:[%s1288_s0 + $0x8] ss:$16 sps:$4 sm:$0xff]   ;;  %v841_v51 = vld [vmem:[%s1288_s0 + $0xc] ss:$16 sps:$4 sm:$0xff]   ;;  %v129_v59 = vld [vmem:[%s1289_s1 + $0x350] sm:$0xff]  ;;  %v818_v63 = vpack.c.bf16 %v146_v47, %v145_v46 }
  0x28   :  { %803 = vmatprep.subr.bf16.mxu1 %v802_v6  ;;  %v839_v50 = vld [vmem:[%s1288_s0 + $0x28] ss:$16 sps:$4 sm:$0xff]   ;;  %v842_v52 = vld [vmem:[%s1288_s0 + $0x2c] ss:$16 sps:$4 sm:$0xff]   ;;  %v207_v56 = vrot.slane %v837_v49, %v1035_v21  ;;  %v214_v61 = vrot.slane %v841_v51, %v1035_v21  ;;  %v115_v1 = vld [vmem:[%s1289_s1 + $0x2e0] sm:$0xff] }
  0x29   :  { %773 = vmatpush3.bf16.msra.mxu0 %v772_v12  ;;  %v98_v58 = vld [vmem:[%s1289_s1 + $0x258] sm:$0xff]  ;;  %v221_v60 = vrot.slane %v839_v50, %v1035_v21  ;;  %v228_v62 = vrot.slane %v842_v52, %v1035_v21  ;;  %v147_v3 = vld [vmem:[%s1289_s1 + $0x3e0] sm:$0xff]  ;;  %v148_v21 = vld [vmem:[%s1289_s1 + $0x3e8] sm:$0xff]  ;;  %v790_v8 = vpack.c.bf16 %v116_v2, %v115_v1 }
  0x2a   :  { %775 = vmatprep.subr.bf16.mxu0 %v774_v14  ;;  %v130_v0 = vld [vmem:[%s1289_s1 + $0x358] sm:$0xff]  ;;  %v788_v6 = vpack.c.bf16 %v98_v58, %v97_v57  ;;  %v99_v9 = vld [vmem:[%s1289_s1 + $0x260] sm:$0xff]  ;;  %v100_v10 = vld [vmem:[%s1289_s1 + $0x268] sm:$0xff]  ;;  %v822_v12 = vpack.c.bf16 %v148_v21, %v147_v3 }
  0x2b   :  { %805 = vmatpush3.bf16.msra.mxu1 %v804_v13  ;;  %v230_v4 = vcombine.high %v207_v56, %v221_v60  ;;  %v232_v5 = vcombine.high %v214_v61, %v228_v62  ;;  %v820_v7 = vpack.c.bf16 %v130_v0, %v129_v59  ;;  %v131_v11 = vld [vmem:[%s1289_s1 + $0x360] sm:$0xff]  ;;  %v132_v13 = vld [vmem:[%s1289_s1 + $0x368] sm:$0xff]  ;;  %v117_v14 = vld [vmem:[%s1289_s1 + $0x2f0] sm:$0xff]  ;;  %v229_v29 = vcombine.low %v207_v56, %v221_v60 }
  0x2c   :  { %807 = vmatprep.subr.bf16.mxu1 %v806_v18  ;;  %v118_v15 = vld [vmem:[%s1289_s1 + $0x2f8] sm:$0xff]  ;;  %v149_v16 = vld [vmem:[%s1289_s1 + $0x3f0] sm:$0xff]  ;;  %v792_v18 = vpack.c.bf16 %v100_v10, %v99_v9  ;;  %v824_v19 = vpack.c.bf16 %v132_v13, %v131_v11  ;;  %v231_v30 = vcombine.low %v214_v61, %v228_v62 }
  0x2d   :  { %777 = vmatpush3.bf16.msra.mxu0 %v776_v25  ;;  %445 = vmatprep.mubr.f32.mxu0 %v230_v4  ;;  %v150_v17 = vld [vmem:[%s1289_s1 + $0x3f8] sm:$0xff]  ;;  %v794_v20 = vpack.c.bf16 %v118_v15, %v117_v14  ;;  %v101_v22 = vld [vmem:[%s1289_s1 + $0x270] sm:$0xff] }
  0x2e   :  { %779 = vmatprep.subr.bf16.mxu0 %v778_v27  ;;  %515 = vmatprep.mubr.f32.mxu1 %v232_v5  ;;  %v102_v23 = vld [vmem:[%s1289_s1 + $0x278] sm:$0xff]  ;;  %v826_v24 = vpack.c.bf16 %v150_v17, %v149_v16  ;;  %v133_v25 = vld [vmem:[%s1289_s1 + $0x370] sm:$0xff] }
  0x2f   :  { %809 = vmatpush3.bf16.msra.mxu1 %v808_v26  ;;  %v134_v26 = vld [vmem:[%s1289_s1 + $0x378] sm:$0xff]  ;;  %v796_v27 = vpack.c.bf16 %v102_v23, %v101_v22 }
  0x30   :  { %811 = vmatprep.subr.bf16.mxu1 %v810_v31  ;;  %v828_v28 = vpack.c.bf16 %v134_v26, %v133_v25 }
  0x31   :  { %781 = vmatpush3.bf16.msra.mxu0 %v780_v40 }
  0x32   :  { %783 = vmatprep.subr.bf16.mxu0 %v782_v45 }
  0x33   :  { %813 = vmatpush3.bf16.msra.mxu1 %v812_v44 }
  0x34   :  { %815 = vmatprep.subr.bf16.mxu1 %v814_v48 }
  0x35   :  { %785 = vmatpush3.bf16.msra.mxu0 %v784_v53 }
  0x36   :  { %787 = vmatprep.subr.bf16.mxu0 %v786_v55 }
  0x37   :  { %817 = vmatpush3.bf16.msra.mxu1 %v816_v54 }
  0x38   :  { %819 = vmatprep.subr.bf16.mxu1 %v818_v63 }
  0x39   :  { %789 = vmatpush3.bf16.msra.mxu0 %v788_v6 }
  0x3a   :  { %791 = vmatprep.subr.bf16.mxu0 %v790_v8 }
  0x3b   :  { %821 = vmatpush3.bf16.msra.mxu1 %v820_v7 }
  0x3c   :  { %823 = vmatprep.subr.bf16.mxu1 %v822_v12 }
  0x3d   :  { %793 = vmatpush3.bf16.msra.mxu0 %v792_v18 }
  0x3e   :  { %795 = vmatprep.subr.bf16.mxu0 %v794_v20 }
  0x3f   :  { %825 = vmatpush3.bf16.msra.mxu1 %v824_v19 }
  0x40   :  { %827 = vmatprep.subr.bf16.mxu1 %v826_v24 }
  0x41   :  { %797 = vmatpush3.bf16.msra.mxu0 %v796_v27 }
  0x43   :  { %829 = vmatpush3.bf16.msra.mxu1 %v828_v28 }
  0x44   :  { %446 = vmatmul.mubr.f32.vlgmr.msra.gmra.mrb[2].mxu0 %v229_v29 }
  0x46   :  { %516 = vmatmul.mubr.f32.vlgmr.msra.gmra.mrb[2].mxu1 %v231_v30 }
  0xf7   :  { %v594_v31 = vpop.f32.mrb[0].mxu0 }
  0xf8   :  { %v595_v33 = vpop.f32.mrb[1].mxu0 }
  0xf9   :  { %v629_v34 = vpop.f32.mrb[0].mxu1  ;;  %v596_v35 = vadd.f32 %v595_v33, %v594_v31 }
  0xfa   :  { %v630_v36 = vpop.f32.mrb[1].mxu1 }
  0xfb   :  { %v631_v37 = vadd.f32 %v630_v36, %v629_v34  ;;  %v308_v38 = vadd.f32 %v596_v35, %v152_v32 }
  0xfd   :  { %v378_v39 = vadd.f32 %v631_v37, %v308_v38 }
 0x117   :  { %v664_v40 = vpop.f32.mrb[2].mxu0 }
 0x118   :  { %v665_v41 = vpop.f32.mrb[3].mxu0 }
 0x119   :  { %v699_v42 = vpop.f32.mrb[2].mxu1  ;;  %v666_v43 = vadd.f32 %v665_v41, %v664_v40 }
 0x11a   :  { %v700_v44 = vpop.f32.mrb[3].mxu1 }
 0x11b   :  { %v701_v45 = vadd.f32 %v700_v44, %v699_v42  ;;  %v448_v46 = vadd.f32 %v666_v43, %v378_v39 }
 0x11d   :  { %v518_v47 = vadd.f32 %v701_v45, %v448_v46 }
 0x11f   :  { %522 = vst.msk [vmem:[#allocation3] sm:$0xff] %vm521_vm0, %v518_v47 }
 0x126   :  { %v540_v48 = vld [vmem:[#allocation3] sm:$0x3] }
 0x127   :  { %541 = vst [vmem:[%s1291_s3] sm:$0x3] %v540_v48 }

</bundles_post_ra>
